<compile_context>
chip_gen: v5e
topology: v5e:2x2
jax: 0.10.0
libtpu: 0.0.40
codegen_flags: <defaults>
</compile_context>

<pallas_src>
import jax
import jax.numpy as jnp
from jax.experimental import pallas as pl
from jax.experimental.pallas import tpu as pltpu

_LANES = 128
_MAX_BLOCK_BYTES = 4 * 1024 * 1024     # ~4 MiB per input block
_MIN_MULTIBLOCK_ROWS = 512             # below this, a single block is cheapest


def _adaptive_act_kernel(c_ref, x_ref, o_ref):
    # c_ref: SMEM scalar (scaling * a), shape (1,), f32
    # x_ref / o_ref: VMEM tiles of the lane-dense (rows, 128) slab
    c = c_ref[0]
    xf = x_ref[...].astype(jnp.float32)      # f32 compute (required on v5e)
    o_ref[...] = jnp.tanh(c * xf).astype(o_ref.dtype)


def _run_kernel_2d(x2d, c):
    """Run the elementwise kernel on a (rows, 128) slab."""
    rows = x2d.shape[0]
    itemsize = jnp.dtype(x2d.dtype).itemsize

    # Byte-budgeted block rows, multiple of 16 (=> multiple of 8 sublanes and
    # full packed rows for 16-bit dtypes).
    max_block_rows = max(16, (_MAX_BLOCK_BYTES // (_LANES * itemsize)) // 16 * 16)

    if rows < _MIN_MULTIBLOCK_ROWS:
        block_rows = rows                     # single full-extent block
    else:
        # At least 2 blocks (pipelining overlap + both v7x TensorCores),
        # capped at the byte budget.
        half = (rows + 1) // 2
        block_rows = min(max_block_rows, ((half + 15) // 16) * 16)
    num_blocks = pl.cdiv(rows, block_rows)

    n_elems = rows * _LANES
    cost = pl.CostEstimate(
        flops=n_elems,
        transcendentals=n_elems,
        bytes_accessed=2 * n_elems * itemsize,
    )

    return pl.pallas_call(
        _adaptive_act_kernel,
        out_shape=jax.ShapeDtypeStruct((rows, _LANES), x2d.dtype),
        grid=(num_blocks,),
        in_specs=[
            pl.BlockSpec(memory_space=pltpu.SMEM),                 # scalar c
            pl.BlockSpec((block_rows, _LANES), lambda i: (i, 0)),  # x tile
        ],
        out_specs=pl.BlockSpec((block_rows, _LANES), lambda i: (i, 0)),
        compiler_params=pltpu.CompilerParams(
            dimension_semantics=("parallel",),
            vmem_limit_bytes=32 * 1024 * 1024,
        ),
        cost_estimate=cost,
    )(c.reshape((1,)), x2d)


@jax.jit
def adaptive_activation(x, a, scaling=1.0):
    """y = tanh(scaling * a * x), elementwise, same shape/dtype as x."""
    orig_shape = x.shape
    orig_dtype = x.dtype

    # Fold the fixed scaling into the runtime scalar (no recompile per value).
    c = jnp.asarray(scaling, jnp.float32) * jnp.asarray(a, jnp.float32)

    flat = x.reshape(-1)
    n = flat.shape[0]
    rows = n // _LANES
    rem = n - rows * _LANES

    if rows == 0:
        # Fewer than 128 elements: not worth a kernel launch.
        y = jnp.tanh(c * flat.astype(jnp.float32)).astype(orig_dtype)
        return y.reshape(orig_shape)

    if rem == 0:
        out2d = _run_kernel_2d(flat.reshape(rows, _LANES), c)
        return out2d.reshape(orig_shape)

    # Ragged size: kernel on the 128-aligned prefix, tiny tail in plain jnp
    # (avoids padding the whole input and re-slicing the whole output).
    main = flat[: rows * _LANES].reshape(rows, _LANES)
    tail = flat[rows * _LANES:]
    out_main = _run_kernel_2d(main, c).reshape(-1)
    out_tail = jnp.tanh(c * tail.astype(jnp.float32)).astype(orig_dtype)
    return jnp.concatenate([out_main, out_tail]).reshape(orig_shape)


if __name__ == "__main__":
    key = jax.random.PRNGKey(0)

    # Deterministic parameter init, matching nn.Parameter(torch.tensor(inital_a)).
    inital_a = 1.0
    scaling = 1.0
    a = jnp.float32(inital_a)

    # Small example consistent with the module's elementwise forward.
    x = jax.random.normal(key, (2, 4, 16, 16), dtype=jnp.float32)
    y = adaptive_activation(x, a, scaling=scaling)
    jax.block_until_ready(y)
    y_ref = jnp.tanh(scaling * a * x)
    assert y.shape == x.shape and y.dtype == x.dtype
    assert jnp.allclose(y, y_ref, atol=1e-6, rtol=1e-6)

    # Ragged-size check (numel % 128 != 0) to lock in the prefix + tail path.
    xr = jax.random.normal(jax.random.PRNGKey(1), (1031,), dtype=jnp.float32)
    yr = adaptive_activation(xr, a, scaling=0.5)
    jax.block_until_ready(yr)
    assert jnp.allclose(yr, jnp.tanh(0.5 * a * xr), atol=1e-6, rtol=1e-6)

    # Mid-size check exercising the multi-block "parallel" grid path.
    xm = jax.random.normal(jax.random.PRNGKey(2), (1024, 256), dtype=jnp.float32)
    ym = adaptive_activation(xm, a, scaling=scaling)
    jax.block_until_ready(ym)
    assert jnp.allclose(ym, jnp.tanh(scaling * a * xm), atol=1e-6, rtol=1e-6)

    print("KERNEL_OK")
</pallas_src>

<mosaic_0001>
module attributes {stable_mosaic.version = 11 : i64} {
  func.func @_adaptive_act_kernel(%arg0: i32, %arg1: memref<1xf32, #tpu.memory_space<smem>>, %arg2: memref<16x128xf32, #tpu.memory_space<vmem>>, %arg3: memref<16x128xf32, #tpu.memory_space<vmem>>) attributes {dimension_semantics = [#tpu.dimension_semantics<parallel>], iteration_bounds = array<i64: 1>, scalar_prefetch = 0 : i64, scratch_operands = 0 : i64, tpu.core_type = #tpu.core_type<tc>, window_params = [{transform_indices = @transform_0, window_bounds = array<i64: 1>}, {transform_indices = @transform_1, window_bounds = array<i64: 16, 128>}, {transform_indices = @transform_2, window_bounds = array<i64: 16, 128>}]} {
    %c0 = arith.constant 0 : index
    %0 = memref.load %arg1[%c0] : memref<1xf32, #tpu.memory_space<smem>>
    %c0_0 = arith.constant 0 : index
    %c0_1 = arith.constant 0 : index
    %1 = vector.load %arg2[%c0_0, %c0_1] : memref<16x128xf32, #tpu.memory_space<vmem>>, vector<16x128xf32>
    %2 = vector.broadcast %0 : f32 to vector<16x128xf32>
    %3 = arith.mulf %2, %1 : vector<16x128xf32>
    %4 = math.tanh %3 : vector<16x128xf32>
    %c0_2 = arith.constant 0 : index
    %c0_3 = arith.constant 0 : index
    %5 = vector.load %arg3[%c0_2, %c0_3] : memref<16x128xf32, #tpu.memory_space<vmem>>, vector<16x128xf32>
    tpu.vector_store %arg3[%c0_2, %c0_3], %4 {strides = array<i32>} : memref<16x128xf32, #tpu.memory_space<vmem>>, vector<16x128xf32>,
    return
  }
  func.func @transform_0(%arg0: i32) -> i32 {
    %c0_i32 = arith.constant 0 : i32
    %c0_i32_0 = arith.constant 0 : i32
    return %c0_i32 : i32
  }
  func.func @transform_1(%arg0: i32) -> (i32, i32) {
    %c0_i32 = arith.constant 0 : i32
    %c0_i32_0 = arith.constant 0 : i32
    return %arg0, %c0_i32 : i32, i32
  }
  func.func @transform_2(%arg0: i32) -> (i32, i32) {
    %c0_i32 = arith.constant 0 : i32
    %c0_i32_0 = arith.constant 0 : i32
    return %arg0, %c0_i32 : i32, i32
  }
}

</mosaic_0001>

<bundles_post_ra>
// kernel: adaptive_activation.1
= control target key start
LH: loop header
LB: loop body
LE: loop exit
PB: predicated region body
PF: predicated region fallthrough
CT: control target
= control target key end

     0   :  { %s60_s0 = inlined_call_operand.<no memory space> [shape: f32[1], index: 0, kind: input, shape index: {}]   ;;  %s61_s1 = inlined_call_operand.vmem [shape: f32[16,128], index: 1, kind: input, shape index: {}]   ;;  %s62_s2 = inlined_call_operand.vmem [shape: f32[16,128], index: 2, kind: output, shape index: {}]  }
   0x1   :  { %v13_v0 = vld [vmem:[%s61_s1] sm:$0xff]  ;;  %v15_v1 = vstv %s60_s0  ;;  %v14_v2 = vld [vmem:[%s61_s1 + $0x8] sm:$0xff] }
   0x2   :  { %v16_v3 = vmul.f32 %v15_v1, %v13_v0  ;;  %v17_v4 = vmul.f32 %v15_v1, %v14_v2 }
   0x4   :  { %26 = vtanh.f32 %v16_v3 }
   0x5   :  { %28 = vtanh.f32 %v17_v4 }
   0xa   :  { %v27_v5 = vpop.eup %26 }
   0xb   :  { %v29_v6 = vpop.eup %28  ;;  %20 = vst [vmem:[%s62_s2] sm:$0xff] %v27_v5 }
   0xc   :  { %21 = vst [vmem:[%s62_s2 + $0x8] sm:$0xff] %v29_v6 }

</bundles_post_ra>
